<compile_context>
chip_gen: v7x
topology: tpu7x:2x2x1
jax: 0.10.0
libtpu: 0.0.40
codegen_flags: <defaults>
</compile_context>

<pallas_src>
import jax
import jax.numpy as jnp
from jax.experimental import pallas as pl
from jax.experimental.pallas import tpu as pltpu

EPS = 1e-5   # torch.nn.GroupNorm default
PAD = 128    # lane-aligned halo so interior scratch stores are vreg-aligned


# ----------------------------- fused Pallas kernel --------------------------

def _make_block_kernel(Cin, Cout, H, W):
    HW = H * W

    def kernel(x_ref, w1_ref, w2_ref, ws_ref, gb_ref, o_ref, pad_ref):
        # Zero the padded staging buffer once per grid step.  The halo columns
        # (never written afterwards) provide the 3x3 conv's zero padding for
        # row overflow; column overflow is handled by a select below.
        pad_ref[...] = jnp.zeros_like(pad_ref)

        px = jax.lax.broadcasted_iota(jnp.int32, (1, HW), 1) % W
        col_ok = {-1: px >= 1, 0: None, 1: px < (W - 1)}

        def conv3x3(a, w_ref, c):
            # a: (c, HW); w_ref: (9, Cout, c).  9 shifted matmuls accumulated
            # in f32; shifts are static lane-window slices of the padded
            # staging buffer (no HBM im2col, everything stays in VMEM).
            pad_ref[0:c, PAD:PAD + HW] = a
            acc = jnp.zeros((Cout, HW), jnp.float32)
            t = 0
            for dy in (-1, 0, 1):
                for dx in (-1, 0, 1):
                    d = dy * W + dx
                    s = pad_ref[0:c, PAD + d:PAD + d + HW]       # (c, HW)
                    if dx != 0:
                        s = jnp.where(col_ok[dx], s, 0.0)
                    acc = acc + jnp.dot(w_ref[t], s,
                                        preferred_element_type=jnp.float32)
                    t += 1
            return acc

        def inorm(a, g, b):
            # GroupNorm(C, C) == per-(n, c) instance norm over H*W (lane axis)
            mean = jnp.mean(a, axis=-1, keepdims=True)
            var = jnp.mean(jnp.square(a - mean), axis=-1, keepdims=True)
            return (a - mean) * jax.lax.rsqrt(var + EPS) * g + b

        g1, b1 = gb_ref[:, 0:1], gb_ref[:, 1:2]
        g2, b2 = gb_ref[:, 2:3], gb_ref[:, 3:4]
        gs, bs = gb_ref[:, 4:5], gb_ref[:, 5:6]

        x = x_ref[0]                                             # (Cin, HW)
        y1 = jnp.maximum(inorm(conv3x3(x, w1_ref, Cin), g1, b1), 0.0)
        y2 = inorm(conv3x3(y1, w2_ref, Cout), g2, b2)
        sc = inorm(jnp.dot(ws_ref[...], x,
                           preferred_element_type=jnp.float32), gs, bs)
        o_ref[0] = jnp.maximum(y2 + sc, 0.0)

    return kernel


def basic_block_pallas(x_nchw, params):
    """Forward of BasicBlock(in_planes, planes, stride=1) with 1x1 shortcut."""
    N, Cin, H, W = x_nchw.shape
    Cout = params["w1"].shape[-1]
    HW = H * W

    # Lane-dense activation layout: (N, C, H*W); H*W goes on the lane axis.
    x3 = x_nchw.reshape(N, Cin, HW).astype(jnp.float32)
    # Weights (3,3,Ci,Co) -> (9, Co, Ci), tap order t = ky*3 + kx.
    w1_9 = jnp.transpose(params["w1"], (0, 1, 3, 2)).reshape(9, Cout, Cin)
    w2_9 = jnp.transpose(params["w2"], (0, 1, 3, 2)).reshape(9, Cout, Cout)
    ws_t = params["ws"].reshape(Cin, Cout).T                    # (Cout, Cin)
    gb = jnp.stack([params["g1"], params["b1"],
                    params["g2"], params["b2"],
                    params["gs"], params["bs"]], axis=1)        # (Cout, 6)

    kernel = _make_block_kernel(Cin, Cout, H, W)
    out = pl.pallas_call(
        kernel,
        out_shape=jax.ShapeDtypeStruct((N, Cout, HW), jnp.float32),
        grid_spec=pltpu.PrefetchScalarGridSpec(
            num_scalar_prefetch=0,
            grid=(N,),
            in_specs=[
                pl.BlockSpec((1, Cin, HW), lambda n: (n, 0, 0)),    # x
                pl.BlockSpec((9, Cout, Cin), lambda n: (0, 0, 0)),  # w1
                pl.BlockSpec((9, Cout, Cout), lambda n: (0, 0, 0)), # w2
                pl.BlockSpec((Cout, Cin), lambda n: (0, 0)),        # ws
                pl.BlockSpec((Cout, 6), lambda n: (0, 0)),          # gamma/beta
            ],
            out_specs=pl.BlockSpec((1, Cout, HW), lambda n: (n, 0, 0)),
            scratch_shapes=[
                pltpu.VMEM((max(Cin, Cout), HW + 2 * PAD), jnp.float32),
            ],
        ),
        compiler_params=pltpu.CompilerParams(
            dimension_semantics=("parallel",),
            vmem_limit_bytes=32 * 1024 * 1024),
    )(x3, w1_9, w2_9, ws_t, gb)
    return out.reshape(N, Cout, H, W)   # NCHW, matching PyTorch


# ----------------------------- params + reference ---------------------------

def init_params(key, in_planes, planes):
    ks = jax.random.split(key, 9)
    return {
        "w1": 0.1 * jax.random.normal(ks[0], (3, 3, in_planes, planes), jnp.float32),
        "w2": 0.1 * jax.random.normal(ks[1], (3, 3, planes, planes), jnp.float32),
        "ws": 0.1 * jax.random.normal(ks[2], (1, 1, in_planes, planes), jnp.float32),
        "g1": 1.0 + 0.1 * jax.random.normal(ks[3], (planes,), jnp.float32),
        "b1": 0.1 * jax.random.normal(ks[4], (planes,), jnp.float32),
        "g2": 1.0 + 0.1 * jax.random.normal(ks[5], (planes,), jnp.float32),
        "b2": 0.1 * jax.random.normal(ks[6], (planes,), jnp.float32),
        "gs": 1.0 + 0.1 * jax.random.normal(ks[7], (planes,), jnp.float32),
        "bs": 0.1 * jax.random.normal(ks[8], (planes,), jnp.float32),
    }


def basic_block_ref(x_nchw, params):
    x = jnp.transpose(x_nchw, (0, 2, 3, 1)).astype(jnp.float32)

    def conv(y, w):
        return jax.lax.conv_general_dilated(
            y, w, (1, 1), "SAME", dimension_numbers=("NHWC", "HWIO", "NHWC"))

    def gn(y_nhwc, gamma, beta):
        y = jnp.transpose(y_nhwc, (0, 3, 1, 2))  # NCHW
        mean = y.mean(axis=(2, 3), keepdims=True)
        var = jnp.square(y - mean).mean(axis=(2, 3), keepdims=True)
        yn = (y - mean) / jnp.sqrt(var + EPS)
        yn = yn * gamma[None, :, None, None] + beta[None, :, None, None]
        return jnp.transpose(yn, (0, 2, 3, 1))

    out = jax.nn.relu(gn(conv(x, params["w1"]), params["g1"], params["b1"]))
    out = gn(conv(out, params["w2"]), params["g2"], params["b2"])
    sc = gn(conv(x, params["ws"]), params["gs"], params["bs"])
    out = jax.nn.relu(out + sc)
    return jnp.transpose(out, (0, 3, 1, 2))


# ----------------------------------- main -----------------------------------

if __name__ == "__main__":
    key = jax.random.PRNGKey(0)
    kx, kp = jax.random.split(key)

    N, in_planes, planes, H, W = 2, 4, 8, 16, 16  # in != out -> conv shortcut
    x = jax.random.normal(kx, (N, in_planes, H, W), jnp.float32)
    params = init_params(kp, in_planes, planes)

    fwd = jax.jit(basic_block_pallas)
    out = jax.block_until_ready(fwd(x, params))

    ref = basic_block_ref(x, params)
    err = float(jnp.max(jnp.abs(out - ref)))
    assert out.shape == (N, planes, H, W), out.shape
    assert err < 1e-3, f"max abs err {err}"

    print("KERNEL_OK")
</pallas_src>

<mosaic_0001>
module attributes {stable_mosaic.version = 11 : i64} {
  func.func @kernel(%arg0: i32, %arg1: memref<1x4x256xf32, #tpu.memory_space<vmem>>, %arg2: memref<9x8x4xf32, #tpu.memory_space<vmem>>, %arg3: memref<9x8x8xf32, #tpu.memory_space<vmem>>, %arg4: memref<8x4xf32, #tpu.memory_space<vmem>>, %arg5: memref<8x6xf32, #tpu.memory_space<vmem>>, %arg6: memref<1x8x256xf32, #tpu.memory_space<vmem>>, %arg7: memref<8x512xf32, #tpu.memory_space<vmem>>) attributes {dimension_semantics = [#tpu.dimension_semantics<parallel>], iteration_bounds = array<i64: 2>, scalar_prefetch = 0 : i64, scratch_operands = 1 : i64, tpu.core_type = #tpu.core_type<tc>, window_params = [{transform_indices = @transform_0, window_bounds = array<i64: 1, 4, 256>}, {pipeline_mode = #tpu.pipeline_mode<synchronous>, transform_indices = @transform_1, window_bounds = array<i64: 9, 8, 4>}, {pipeline_mode = #tpu.pipeline_mode<synchronous>, transform_indices = @transform_2, window_bounds = array<i64: 9, 8, 8>}, {pipeline_mode = #tpu.pipeline_mode<synchronous>, transform_indices = @transform_3, window_bounds = array<i64: 8, 4>}, {pipeline_mode = #tpu.pipeline_mode<synchronous>, transform_indices = @transform_4, window_bounds = array<i64: 8, 6>}, {transform_indices = @transform_5, window_bounds = array<i64: 1, 8, 256>}]} {
    %cst = arith.constant 0.000000e+00 : f32
    %0 = vector.broadcast %cst : f32 to vector<8x512xf32>
    %c0 = arith.constant 0 : index
    %c0_0 = arith.constant 0 : index
    %1 = vector.load %arg7[%c0, %c0_0] : memref<8x512xf32, #tpu.memory_space<vmem>>, vector<8x512xf32>
    tpu.vector_store %arg7[%c0, %c0_0], %0 {strides = array<i32>} : memref<8x512xf32, #tpu.memory_space<vmem>>, vector<8x512xf32>,
    %2 = tpu.iota {dimensions = array<i32: 1>} : vector<1x256xi32>
    %c16_i32 = arith.constant 16 : i32
    %c0_i32 = arith.constant 0 : i32
    %3 = arith.cmpi eq, %c16_i32, %c0_i32 : i32
    %c1_i32 = arith.constant 1 : i32
    %4 = arith.select %3, %c1_i32, %c16_i32 : i32
    %5 = vector.broadcast %4 : i32 to vector<1x256xi32>
    %6 = arith.remsi %2, %5 : vector<1x256xi32>
    %c0_i32_1 = arith.constant 0 : i32
    %7 = vector.broadcast %c0_i32_1 : i32 to vector<1x256xi32>
    %8 = arith.cmpi ne, %6, %7 : vector<1x256xi32>
    %c0_i32_2 = arith.constant 0 : i32
    %9 = vector.broadcast %c0_i32_2 : i32 to vector<1x256xi32>
    %10 = arith.cmpi slt, %6, %9 : vector<1x256xi32>
    %c0_i32_3 = arith.constant 0 : i32
    %11 = arith.cmpi slt, %4, %c0_i32_3 : i32
    %12 = vector.broadcast %11 : i1 to vector<1x256xi1>
    %13 = vector.broadcast %12 : vector<1x256xi1> to vector<1x256xi1>
    %14 = arith.xori %10, %13 : vector<1x256xi1>
    %15 = arith.andi %14, %8 : vector<1x256xi1>
    %16 = vector.broadcast %4 : i32 to vector<1x256xi32>
    %17 = arith.addi %6, %16 : vector<1x256xi32>
    %18 = arith.select %15, %17, %6 : vector<1x256xi1>, vector<1x256xi32>
    %c1_i32_4 = arith.constant 1 : i32
    %19 = vector.broadcast %c1_i32_4 : i32 to vector<1x256xi32>
    %20 = arith.cmpi sge, %18, %19 : vector<1x256xi32>
    %c15_i32 = arith.constant 15 : i32
    %21 = vector.broadcast %c15_i32 : i32 to vector<1x256xi32>
    %22 = arith.cmpi slt, %18, %21 : vector<1x256xi32>
    %c0_5 = arith.constant 0 : index
    %c0_6 = arith.constant 0 : index
    %23 = vector.load %arg5[%c0_5, %c0_6] : memref<8x6xf32, #tpu.memory_space<vmem>>, vector<8x1xf32>
    %c0_7 = arith.constant 0 : index
    %c1 = arith.constant 1 : index
    %24 = vector.load %arg5[%c0_7, %c1] : memref<8x6xf32, #tpu.memory_space<vmem>>, vector<8x1xf32>
    %c0_8 = arith.constant 0 : index
    %c2 = arith.constant 2 : index
    %25 = vector.load %arg5[%c0_8, %c2] : memref<8x6xf32, #tpu.memory_space<vmem>>, vector<8x1xf32>
    %c0_9 = arith.constant 0 : index
    %c3 = arith.constant 3 : index
    %26 = vector.load %arg5[%c0_9, %c3] : memref<8x6xf32, #tpu.memory_space<vmem>>, vector<8x1xf32>
    %c0_10 = arith.constant 0 : index
    %c4 = arith.constant 4 : index
    %27 = vector.load %arg5[%c0_10, %c4] : memref<8x6xf32, #tpu.memory_space<vmem>>, vector<8x1xf32>
    %c0_11 = arith.constant 0 : index
    %c5 = arith.constant 5 : index
    %28 = vector.load %arg5[%c0_11, %c5] : memref<8x6xf32, #tpu.memory_space<vmem>>, vector<8x1xf32>
    %c0_12 = arith.constant 0 : index
    %c0_13 = arith.constant 0 : index
    %c0_14 = arith.constant 0 : index
    %29 = vector.load %arg1[%c0_12, %c0_13, %c0_14] : memref<1x4x256xf32, #tpu.memory_space<vmem>>, vector<1x4x256xf32>
    %30 = vector.shape_cast %29 : vector<1x4x256xf32> to vector<4x256xf32>
    %c0_15 = arith.constant 0 : index
    %c128 = arith.constant 128 : index
    %31 = vector.load %arg7[%c0_15, %c128] : memref<8x512xf32, #tpu.memory_space<vmem>>, vector<4x256xf32>
    tpu.vector_store %arg7[%c0_15, %c128], %30 {strides = array<i32>} : memref<8x512xf32, #tpu.memory_space<vmem>>, vector<4x256xf32>,
    %cst_16 = arith.constant 0.000000e+00 : f32
    %32 = vector.broadcast %cst_16 : f32 to vector<8x256xf32>
    %c0_17 = arith.constant 0 : index
    %c111 = arith.constant 111 : index
    %33 = vector.load %arg7[%c0_17, %c111] : memref<8x512xf32, #tpu.memory_space<vmem>>, vector<4x256xf32>
    %cst_18 = arith.constant 0.000000e+00 : f32
    %34 = vector.shape_cast %20 : vector<1x256xi1> to vector<1x256xi1>
    %35 = vector.broadcast %34 : vector<1x256xi1> to vector<4x256xi1>
    %36 = vector.broadcast %cst_18 : f32 to vector<4x256xf32>
    %37 = arith.select %35, %33, %36 : vector<4x256xi1>, vector<4x256xf32>
    %c0_19 = arith.constant 0 : index
    %c0_20 = arith.constant 0 : index
    %c0_21 = arith.constant 0 : index
    %38 = vector.load %arg2[%c0_19, %c0_20, %c0_21] : memref<9x8x4xf32, #tpu.memory_space<vmem>>, vector<1x8x4xf32>
    %39 = vector.shape_cast %38 : vector<1x8x4xf32> to vector<8x4xf32>
    %cst_22 = arith.constant dense<0.000000e+00> : vector<8x256xf32>
    %40 = tpu.matmul %39, %37, %cst_22 {dimension_numbers = #tpu.dot_dimension_numbers<[1], [0], [0], [1], [0, 0, 1, 1], [], []>} : vector<8x4xf32>, vector<4x256xf32>, vector<8x256xf32> -> vector<8x256xf32>
    %41 = arith.addf %32, %40 : vector<8x256xf32>
    %c0_23 = arith.constant 0 : index
    %c112 = arith.constant 112 : index
    %42 = vector.load %arg7[%c0_23, %c112] : memref<8x512xf32, #tpu.memory_space<vmem>>, vector<4x256xf32>
    %c1_24 = arith.constant 1 : index
    %c0_25 = arith.constant 0 : index
    %c0_26 = arith.constant 0 : index
    %43 = vector.load %arg2[%c1_24, %c0_25, %c0_26] : memref<9x8x4xf32, #tpu.memory_space<vmem>>, vector<1x8x4xf32>
    %44 = vector.shape_cast %43 : vector<1x8x4xf32> to vector<8x4xf32>
    %cst_27 = arith.constant dense<0.000000e+00> : vector<8x256xf32>
    %45 = tpu.matmul %44, %42, %cst_27 {dimension_numbers = #tpu.dot_dimension_numbers<[1], [0], [0], [1], [0, 0, 1, 1], [], []>} : vector<8x4xf32>, vector<4x256xf32>, vector<8x256xf32> -> vector<8x256xf32>
    %46 = arith.addf %41, %45 : vector<8x256xf32>
    %c0_28 = arith.constant 0 : index
    %c113 = arith.constant 113 : index
    %47 = vector.load %arg7[%c0_28, %c113] : memref<8x512xf32, #tpu.memory_space<vmem>>, vector<4x256xf32>
    %cst_29 = arith.constant 0.000000e+00 : f32
    %48 = vector.shape_cast %22 : vector<1x256xi1> to vector<1x256xi1>
    %49 = vector.broadcast %48 : vector<1x256xi1> to vector<4x256xi1>
    %50 = vector.broadcast %cst_29 : f32 to vector<4x256xf32>
    %51 = arith.select %49, %47, %50 : vector<4x256xi1>, vector<4x256xf32>
    %c2_30 = arith.constant 2 : index
    %c0_31 = arith.constant 0 : index
    %c0_32 = arith.constant 0 : index
    %52 = vector.load %arg2[%c2_30, %c0_31, %c0_32] : memref<9x8x4xf32, #tpu.memory_space<vmem>>, vector<1x8x4xf32>
    %53 = vector.shape_cast %52 : vector<1x8x4xf32> to vector<8x4xf32>
    %cst_33 = arith.constant dense<0.000000e+00> : vector<8x256xf32>
    %54 = tpu.matmul %53, %51, %cst_33 {dimension_numbers = #tpu.dot_dimension_numbers<[1], [0], [0], [1], [0, 0, 1, 1], [], []>} : vector<8x4xf32>, vector<4x256xf32>, vector<8x256xf32> -> vector<8x256xf32>
    %55 = arith.addf %46, %54 : vector<8x256xf32>
    %c0_34 = arith.constant 0 : index
    %c127 = arith.constant 127 : index
    %56 = vector.load %arg7[%c0_34, %c127] : memref<8x512xf32, #tpu.memory_space<vmem>>, vector<4x256xf32>
    %cst_35 = arith.constant 0.000000e+00 : f32
    %57 = vector.shape_cast %20 : vector<1x256xi1> to vector<1x256xi1>
    %58 = vector.broadcast %57 : vector<1x256xi1> to vector<4x256xi1>
    %59 = vector.broadcast %cst_35 : f32 to vector<4x256xf32>
    %60 = arith.select %58, %56, %59 : vector<4x256xi1>, vector<4x256xf32>
    %c3_36 = arith.constant 3 : index
    %c0_37 = arith.constant 0 : index
    %c0_38 = arith.constant 0 : index
    %61 = vector.load %arg2[%c3_36, %c0_37, %c0_38] : memref<9x8x4xf32, #tpu.memory_space<vmem>>, vector<1x8x4xf32>
    %62 = vector.shape_cast %61 : vector<1x8x4xf32> to vector<8x4xf32>
    %cst_39 = arith.constant dense<0.000000e+00> : vector<8x256xf32>
    %63 = tpu.matmul %62, %60, %cst_39 {dimension_numbers = #tpu.dot_dimension_numbers<[1], [0], [0], [1], [0, 0, 1, 1], [], []>} : vector<8x4xf32>, vector<4x256xf32>, vector<8x256xf32> -> vector<8x256xf32>
    %64 = arith.addf %55, %63 : vector<8x256xf32>
    %c0_40 = arith.constant 0 : index
    %c128_41 = arith.constant 128 : index
    %65 = vector.load %arg7[%c0_40, %c128_41] : memref<8x512xf32, #tpu.memory_space<vmem>>, vector<4x256xf32>
    %c4_42 = arith.constant 4 : index
    %c0_43 = arith.constant 0 : index
    %c0_44 = arith.constant 0 : index
    %66 = vector.load %arg2[%c4_42, %c0_43, %c0_44] : memref<9x8x4xf32, #tpu.memory_space<vmem>>, vector<1x8x4xf32>
    %67 = vector.shape_cast %66 : vector<1x8x4xf32> to vector<8x4xf32>
    %cst_45 = arith.constant dense<0.000000e+00> : vector<8x256xf32>
    %68 = tpu.matmul %67, %65, %cst_45 {dimension_numbers = #tpu.dot_dimension_numbers<[1], [0], [0], [1], [0, 0, 1, 1], [], []>} : vector<8x4xf32>, vector<4x256xf32>, vector<8x256xf32> -> vector<8x256xf32>
    %69 = arith.addf %64, %68 : vector<8x256xf32>
    %c0_46 = arith.constant 0 : index
    %c129 = arith.constant 129 : index
    %70 = vector.load %arg7[%c0_46, %c129] : memref<8x512xf32, #tpu.memory_space<vmem>>, vector<4x256xf32>
    %cst_47 = arith.constant 0.000000e+00 : f32
    %71 = vector.shape_cast %22 : vector<1x256xi1> to vector<1x256xi1>
    %72 = vector.broadcast %71 : vector<1x256xi1> to vector<4x256xi1>
    %73 = vector.broadcast %cst_47 : f32 to vector<4x256xf32>
    %74 = arith.select %72, %70, %73 : vector<4x256xi1>, vector<4x256xf32>
    %c5_48 = arith.constant 5 : index
    %c0_49 = arith.constant 0 : index
    %c0_50 = arith.constant 0 : index
    %75 = vector.load %arg2[%c5_48, %c0_49, %c0_50] : memref<9x8x4xf32, #tpu.memory_space<vmem>>, vector<1x8x4xf32>
    %76 = vector.shape_cast %75 : vector<1x8x4xf32> to vector<8x4xf32>
    %cst_51 = arith.constant dense<0.000000e+00> : vector<8x256xf32>
    %77 = tpu.matmul %76, %74, %cst_51 {dimension_numbers = #tpu.dot_dimension_numbers<[1], [0], [0], [1], [0, 0, 1, 1], [], []>} : vector<8x4xf32>, vector<4x256xf32>, vector<8x256xf32> -> vector<8x256xf32>
    %78 = arith.addf %69, %77 : vector<8x256xf32>
    %c0_52 = arith.constant 0 : index
    %c143 = arith.constant 143 : index
    %79 = vector.load %arg7[%c0_52, %c143] : memref<8x512xf32, #tpu.memory_space<vmem>>, vector<4x256xf32>
    %cst_53 = arith.constant 0.000000e+00 : f32
    %80 = vector.shape_cast %20 : vector<1x256xi1> to vector<1x256xi1>
    %81 = vector.broadcast %80 : vector<1x256xi1> to vector<4x256xi1>
    %82 = vector.broadcast %cst_53 : f32 to vector<4x256xf32>
    %83 = arith.select %81, %79, %82 : vector<4x256xi1>, vector<4x256xf32>
    %c6 = arith.constant 6 : index
    %c0_54 = arith.constant 0 : index
    %c0_55 = arith.constant 0 : index
    %84 = vector.load %arg2[%c6, %c0_54, %c0_55] : memref<9x8x4xf32, #tpu.memory_space<vmem>>, vector<1x8x4xf32>
    %85 = vector.shape_cast %84 : vector<1x8x4xf32> to vector<8x4xf32>
    %cst_56 = arith.constant dense<0.000000e+00> : vector<8x256xf32>
    %86 = tpu.matmul %85, %83, %cst_56 {dimension_numbers = #tpu.dot_dimension_numbers<[1], [0], [0], [1], [0, 0, 1, 1], [], []>} : vector<8x4xf32>, vector<4x256xf32>, vector<8x256xf32> -> vector<8x256xf32>
    %87 = arith.addf %78, %86 : vector<8x256xf32>
    %c0_57 = arith.constant 0 : index
    %c144 = arith.constant 144 : index
    %88 = vector.load %arg7[%c0_57, %c144] : memref<8x512xf32, #tpu.memory_space<vmem>>, vector<4x256xf32>
    %c7 = arith.constant 7 : index
    %c0_58 = arith.constant 0 : index
    %c0_59 = arith.constant 0 : index
    %89 = vector.load %arg2[%c7, %c0_58, %c0_59] : memref<9x8x4xf32, #tpu.memory_space<vmem>>, vector<1x8x4xf32>
    %90 = vector.shape_cast %89 : vector<1x8x4xf32> to vector<8x4xf32>
    %cst_60 = arith.constant dense<0.000000e+00> : vector<8x256xf32>
    %91 = tpu.matmul %90, %88, %cst_60 {dimension_numbers = #tpu.dot_dimension_numbers<[1], [0], [0], [1], [0, 0, 1, 1], [], []>} : vector<8x4xf32>, vector<4x256xf32>, vector<8x256xf32> -> vector<8x256xf32>
    %92 = arith.addf %87, %91 : vector<8x256xf32>
    %c0_61 = arith.constant 0 : index
    %c145 = arith.constant 145 : index
    %93 = vector.load %arg7[%c0_61, %c145] : memref<8x512xf32, #tpu.memory_space<vmem>>, vector<4x256xf32>
    %cst_62 = arith.constant 0.000000e+00 : f32
    %94 = vector.shape_cast %22 : vector<1x256xi1> to vector<1x256xi1>
    %95 = vector.broadcast %94 : vector<1x256xi1> to vector<4x256xi1>
    %96 = vector.broadcast %cst_62 : f32 to vector<4x256xf32>
    %97 = arith.select %95, %93, %96 : vector<4x256xi1>, vector<4x256xf32>
    %c8 = arith.constant 8 : index
    %c0_63 = arith.constant 0 : index
    %c0_64 = arith.constant 0 : index
    %98 = vector.load %arg2[%c8, %c0_63, %c0_64] : memref<9x8x4xf32, #tpu.memory_space<vmem>>, vector<1x8x4xf32>
    %99 = vector.shape_cast %98 : vector<1x8x4xf32> to vector<8x4xf32>
    %cst_65 = arith.constant dense<0.000000e+00> : vector<8x256xf32>
    %100 = tpu.matmul %99, %97, %cst_65 {dimension_numbers = #tpu.dot_dimension_numbers<[1], [0], [0], [1], [0, 0, 1, 1], [], []>} : vector<8x4xf32>, vector<4x256xf32>, vector<8x256xf32> -> vector<8x256xf32>
    %101 = arith.addf %92, %100 : vector<8x256xf32>
    %cst_66 = arith.constant dense<0.000000e+00> : vector<8xf32>
    %102 = vector.multi_reduction <add>, %101, %cst_66 [1] : vector<8x256xf32> to vector<8xf32>
    %103 = vector.shape_cast %102 : vector<8xf32> to vector<8x1xf32>
    %cst_67 = arith.constant 2.560000e+02 : f32
    %104 = vector.broadcast %cst_67 : f32 to vector<8x1xf32>
    %105 = arith.divf %103, %104 : vector<8x1xf32>
    %106 = vector.broadcast %105 : vector<8x1xf32> to vector<8x256xf32>
    %107 = arith.subf %101, %106 : vector<8x256xf32>
    %108 = arith.mulf %107, %107 : vector<8x256xf32>
    %cst_68 = arith.constant dense<0.000000e+00> : vector<8xf32>
    %109 = vector.multi_reduction <add>, %108, %cst_68 [1] : vector<8x256xf32> to vector<8xf32>
    %110 = vector.shape_cast %109 : vector<8xf32> to vector<8x1xf32>
    %cst_69 = arith.constant 2.560000e+02 : f32
    %111 = vector.broadcast %cst_69 : f32 to vector<8x1xf32>
    %112 = arith.divf %110, %111 : vector<8x1xf32>
    %113 = vector.broadcast %105 : vector<8x1xf32> to vector<8x256xf32>
    %114 = arith.subf %101, %113 : vector<8x256xf32>
    %cst_70 = arith.constant 9.99999974E-6 : f32
    %115 = vector.broadcast %cst_70 : f32 to vector<8x1xf32>
    %116 = arith.addf %112, %115 : vector<8x1xf32>
    %117 = math.rsqrt %116 : vector<8x1xf32>
    %118 = vector.broadcast %117 : vector<8x1xf32> to vector<8x256xf32>
    %119 = arith.mulf %114, %118 : vector<8x256xf32>
    %120 = vector.broadcast %23 : vector<8x1xf32> to vector<8x256xf32>
    %121 = arith.mulf %119, %120 : vector<8x256xf32>
    %122 = vector.broadcast %24 : vector<8x1xf32> to vector<8x256xf32>
    %123 = arith.addf %121, %122 : vector<8x256xf32>
    %cst_71 = arith.constant 0.000000e+00 : f32
    %124 = vector.broadcast %cst_71 : f32 to vector<8x256xf32>
    %125 = arith.maximumf %123, %124 : vector<8x256xf32>
    %c0_72 = arith.constant 0 : index
    %c128_73 = arith.constant 128 : index
    %126 = vector.load %arg7[%c0_72, %c128_73] : memref<8x512xf32, #tpu.memory_space<vmem>>, vector<8x256xf32>
    tpu.vector_store %arg7[%c0_72, %c128_73], %125 {strides = array<i32>} : memref<8x512xf32, #tpu.memory_space<vmem>>, vector<8x256xf32>,
    %cst_74 = arith.constant 0.000000e+00 : f32
    %127 = vector.broadcast %cst_74 : f32 to vector<8x256xf32>
    %c0_75 = arith.constant 0 : index
    %c111_76 = arith.constant 111 : index
    %128 = vector.load %arg7[%c0_75, %c111_76] : memref<8x512xf32, #tpu.memory_space<vmem>>, vector<8x256xf32>
    %cst_77 = arith.constant 0.000000e+00 : f32
    %129 = vector.shape_cast %20 : vector<1x256xi1> to vector<1x256xi1>
    %130 = vector.broadcast %129 : vector<1x256xi1> to vector<8x256xi1>
    %131 = vector.broadcast %cst_77 : f32 to vector<8x256xf32>
    %132 = arith.select %130, %128, %131 : vector<8x256xi1>, vector<8x256xf32>
    %c0_78 = arith.constant 0 : index
    %c0_79 = arith.constant 0 : index
    %c0_80 = arith.constant 0 : index
    %133 = vector.load %arg3[%c0_78, %c0_79, %c0_80] : memref<9x8x8xf32, #tpu.memory_space<vmem>>, vector<1x8x8xf32>
    %134 = vector.shape_cast %133 : vector<1x8x8xf32> to vector<8x8xf32>
    %cst_81 = arith.constant dense<0.000000e+00> : vector<8x256xf32>
    %135 = tpu.matmul %134, %132, %cst_81 {dimension_numbers = #tpu.dot_dimension_numbers<[1], [0], [0], [1], [0, 0, 1, 1], [], []>} : vector<8x8xf32>, vector<8x256xf32>, vector<8x256xf32> -> vector<8x256xf32>
    %136 = arith.addf %127, %135 : vector<8x256xf32>
    %c0_82 = arith.constant 0 : index
    %c112_83 = arith.constant 112 : index
    %137 = vector.load %arg7[%c0_82, %c112_83] : memref<8x512xf32, #tpu.memory_space<vmem>>, vector<8x256xf32>
    %c1_84 = arith.constant 1 : index
    %c0_85 = arith.constant 0 : index
    %c0_86 = arith.constant 0 : index
    %138 = vector.load %arg3[%c1_84, %c0_85, %c0_86] : memref<9x8x8xf32, #tpu.memory_space<vmem>>, vector<1x8x8xf32>
    %139 = vector.shape_cast %138 : vector<1x8x8xf32> to vector<8x8xf32>
    %cst_87 = arith.constant dense<0.000000e+00> : vector<8x256xf32>
    %140 = tpu.matmul %139, %137, %cst_87 {dimension_numbers = #tpu.dot_dimension_numbers<[1], [0], [0], [1], [0, 0, 1, 1], [], []>} : vector<8x8xf32>, vector<8x256xf32>, vector<8x256xf32> -> vector<8x256xf32>
    %141 = arith.addf %136, %140 : vector<8x256xf32>
    %c0_88 = arith.constant 0 : index
    %c113_89 = arith.constant 113 : index
    %142 = vector.load %arg7[%c0_88, %c113_89] : memref<8x512xf32, #tpu.memory_space<vmem>>, vector<8x256xf32>
    %cst_90 = arith.constant 0.000000e+00 : f32
    %143 = vector.shape_cast %22 : vector<1x256xi1> to vector<1x256xi1>
    %144 = vector.broadcast %143 : vector<1x256xi1> to vector<8x256xi1>
    %145 = vector.broadcast %cst_90 : f32 to vector<8x256xf32>
    %146 = arith.select %144, %142, %145 : vector<8x256xi1>, vector<8x256xf32>
    %c2_91 = arith.constant 2 : index
    %c0_92 = arith.constant 0 : index
    %c0_93 = arith.constant 0 : index
    %147 = vector.load %arg3[%c2_91, %c0_92, %c0_93] : memref<9x8x8xf32, #tpu.memory_space<vmem>>, vector<1x8x8xf32>
    %148 = vector.shape_cast %147 : vector<1x8x8xf32> to vector<8x8xf32>
    %cst_94 = arith.constant dense<0.000000e+00> : vector<8x256xf32>
    %149 = tpu.matmul %148, %146, %cst_94 {dimension_numbers = #tpu.dot_dimension_numbers<[1], [0], [0], [1], [0, 0, 1, 1], [], []>} : vector<8x8xf32>, vector<8x256xf32>, vector<8x256xf32> -> vector<8x256xf32>
    %150 = arith.addf %141, %149 : vector<8x256xf32>
    %c0_95 = arith.constant 0 : index
    %c127_96 = arith.constant 127 : index
    %151 = vector.load %arg7[%c0_95, %c127_96] : memref<8x512xf32, #tpu.memory_space<vmem>>, vector<8x256xf32>
    %cst_97 = arith.constant 0.000000e+00 : f32
    %152 = vector.shape_cast %20 : vector<1x256xi1> to vector<1x256xi1>
    %153 = vector.broadcast %152 : vector<1x256xi1> to vector<8x256xi1>
    %154 = vector.broadcast %cst_97 : f32 to vector<8x256xf32>
    %155 = arith.select %153, %151, %154 : vector<8x256xi1>, vector<8x256xf32>
    %c3_98 = arith.constant 3 : index
    %c0_99 = arith.constant 0 : index
    %c0_100 = arith.constant 0 : index
    %156 = vector.load %arg3[%c3_98, %c0_99, %c0_100] : memref<9x8x8xf32, #tpu.memory_space<vmem>>, vector<1x8x8xf32>
    %157 = vector.shape_cast %156 : vector<1x8x8xf32> to vector<8x8xf32>
    %cst_101 = arith.constant dense<0.000000e+00> : vector<8x256xf32>
    %158 = tpu.matmul %157, %155, %cst_101 {dimension_numbers = #tpu.dot_dimension_numbers<[1], [0], [0], [1], [0, 0, 1, 1], [], []>} : vector<8x8xf32>, vector<8x256xf32>, vector<8x256xf32> -> vector<8x256xf32>
    %159 = arith.addf %150, %158 : vector<8x256xf32>
    %c0_102 = arith.constant 0 : index
    %c128_103 = arith.constant 128 : index
    %160 = vector.load %arg7[%c0_102, %c128_103] : memref<8x512xf32, #tpu.memory_space<vmem>>, vector<8x256xf32>
    %c4_104 = arith.constant 4 : index
    %c0_105 = arith.constant 0 : index
    %c0_106 = arith.constant 0 : index
    %161 = vector.load %arg3[%c4_104, %c0_105, %c0_106] : memref<9x8x8xf32, #tpu.memory_space<vmem>>, vector<1x8x8xf32>
    %162 = vector.shape_cast %161 : vector<1x8x8xf32> to vector<8x8xf32>
    %cst_107 = arith.constant dense<0.000000e+00> : vector<8x256xf32>
    %163 = tpu.matmul %162, %160, %cst_107 {dimension_numbers = #tpu.dot_dimension_numbers<[1], [0], [0], [1], [0, 0, 1, 1], [], []>} : vector<8x8xf32>, vector<8x256xf32>, vector<8x256xf32> -> vector<8x256xf32>
    %164 = arith.addf %159, %163 : vector<8x256xf32>
    %c0_108 = arith.constant 0 : index
    %c129_109 = arith.constant 129 : index
    %165 = vector.load %arg7[%c0_108, %c129_109] : memref<8x512xf32, #tpu.memory_space<vmem>>, vector<8x256xf32>
    %cst_110 = arith.constant 0.000000e+00 : f32
    %166 = vector.shape_cast %22 : vector<1x256xi1> to vector<1x256xi1>
    %167 = vector.broadcast %166 : vector<1x256xi1> to vector<8x256xi1>
    %168 = vector.broadcast %cst_110 : f32 to vector<8x256xf32>
    %169 = arith.select %167, %165, %168 : vector<8x256xi1>, vector<8x256xf32>
    %c5_111 = arith.constant 5 : index
    %c0_112 = arith.constant 0 : index
    %c0_113 = arith.constant 0 : index
    %170 = vector.load %arg3[%c5_111, %c0_112, %c0_113] : memref<9x8x8xf32, #tpu.memory_space<vmem>>, vector<1x8x8xf32>
    %171 = vector.shape_cast %170 : vector<1x8x8xf32> to vector<8x8xf32>
    %cst_114 = arith.constant dense<0.000000e+00> : vector<8x256xf32>
    %172 = tpu.matmul %171, %169, %cst_114 {dimension_numbers = #tpu.dot_dimension_numbers<[1], [0], [0], [1], [0, 0, 1, 1], [], []>} : vector<8x8xf32>, vector<8x256xf32>, vector<8x256xf32> -> vector<8x256xf32>
    %173 = arith.addf %164, %172 : vector<8x256xf32>
    %c0_115 = arith.constant 0 : index
    %c143_116 = arith.constant 143 : index
    %174 = vector.load %arg7[%c0_115, %c143_116] : memref<8x512xf32, #tpu.memory_space<vmem>>, vector<8x256xf32>
    %cst_117 = arith.constant 0.000000e+00 : f32
    %175 = vector.shape_cast %20 : vector<1x256xi1> to vector<1x256xi1>
    %176 = vector.broadcast %175 : vector<1x256xi1> to vector<8x256xi1>
    %177 = vector.broadcast %cst_117 : f32 to vector<8x256xf32>
    %178 = arith.select %176, %174, %177 : vector<8x256xi1>, vector<8x256xf32>
    %c6_118 = arith.constant 6 : index
    %c0_119 = arith.constant 0 : index
    %c0_120 = arith.constant 0 : index
    %179 = vector.load %arg3[%c6_118, %c0_119, %c0_120] : memref<9x8x8xf32, #tpu.memory_space<vmem>>, vector<1x8x8xf32>
    %180 = vector.shape_cast %179 : vector<1x8x8xf32> to vector<8x8xf32>
    %cst_121 = arith.constant dense<0.000000e+00> : vector<8x256xf32>
    %181 = tpu.matmul %180, %178, %cst_121 {dimension_numbers = #tpu.dot_dimension_numbers<[1], [0], [0], [1], [0, 0, 1, 1], [], []>} : vector<8x8xf32>, vector<8x256xf32>, vector<8x256xf32> -> vector<8x256xf32>
    %182 = arith.addf %173, %181 : vector<8x256xf32>
    %c0_122 = arith.constant 0 : index
    %c144_123 = arith.constant 144 : index
    %183 = vector.load %arg7[%c0_122, %c144_123] : memref<8x512xf32, #tpu.memory_space<vmem>>, vector<8x256xf32>
    %c7_124 = arith.constant 7 : index
    %c0_125 = arith.constant 0 : index
    %c0_126 = arith.constant 0 : index
    %184 = vector.load %arg3[%c7_124, %c0_125, %c0_126] : memref<9x8x8xf32, #tpu.memory_space<vmem>>, vector<1x8x8xf32>
    %185 = vector.shape_cast %184 : vector<1x8x8xf32> to vector<8x8xf32>
    %cst_127 = arith.constant dense<0.000000e+00> : vector<8x256xf32>
    %186 = tpu.matmul %185, %183, %cst_127 {dimension_numbers = #tpu.dot_dimension_numbers<[1], [0], [0], [1], [0, 0, 1, 1], [], []>} : vector<8x8xf32>, vector<8x256xf32>, vector<8x256xf32> -> vector<8x256xf32>
    %187 = arith.addf %182, %186 : vector<8x256xf32>
    %c0_128 = arith.constant 0 : index
    %c145_129 = arith.constant 145 : index
    %188 = vector.load %arg7[%c0_128, %c145_129] : memref<8x512xf32, #tpu.memory_space<vmem>>, vector<8x256xf32>
    %cst_130 = arith.constant 0.000000e+00 : f32
    %189 = vector.shape_cast %22 : vector<1x256xi1> to vector<1x256xi1>
    %190 = vector.broadcast %189 : vector<1x256xi1> to vector<8x256xi1>
    %191 = vector.broadcast %cst_130 : f32 to vector<8x256xf32>
    %192 = arith.select %190, %188, %191 : vector<8x256xi1>, vector<8x256xf32>
    %c8_131 = arith.constant 8 : index
    %c0_132 = arith.constant 0 : index
    %c0_133 = arith.constant 0 : index
    %193 = vector.load %arg3[%c8_131, %c0_132, %c0_133] : memref<9x8x8xf32, #tpu.memory_space<vmem>>, vector<1x8x8xf32>
    %194 = vector.shape_cast %193 : vector<1x8x8xf32> to vector<8x8xf32>
    %cst_134 = arith.constant dense<0.000000e+00> : vector<8x256xf32>
    %195 = tpu.matmul %194, %192, %cst_134 {dimension_numbers = #tpu.dot_dimension_numbers<[1], [0], [0], [1], [0, 0, 1, 1], [], []>} : vector<8x8xf32>, vector<8x256xf32>, vector<8x256xf32> -> vector<8x256xf32>
    %196 = arith.addf %187, %195 : vector<8x256xf32>
    %cst_135 = arith.constant dense<0.000000e+00> : vector<8xf32>
    %197 = vector.multi_reduction <add>, %196, %cst_135 [1] : vector<8x256xf32> to vector<8xf32>
    %198 = vector.shape_cast %197 : vector<8xf32> to vector<8x1xf32>
    %cst_136 = arith.constant 2.560000e+02 : f32
    %199 = vector.broadcast %cst_136 : f32 to vector<8x1xf32>
    %200 = arith.divf %198, %199 : vector<8x1xf32>
    %201 = vector.broadcast %200 : vector<8x1xf32> to vector<8x256xf32>
    %202 = arith.subf %196, %201 : vector<8x256xf32>
    %203 = arith.mulf %202, %202 : vector<8x256xf32>
    %cst_137 = arith.constant dense<0.000000e+00> : vector<8xf32>
    %204 = vector.multi_reduction <add>, %203, %cst_137 [1] : vector<8x256xf32> to vector<8xf32>
    %205 = vector.shape_cast %204 : vector<8xf32> to vector<8x1xf32>
    %cst_138 = arith.constant 2.560000e+02 : f32
    %206 = vector.broadcast %cst_138 : f32 to vector<8x1xf32>
    %207 = arith.divf %205, %206 : vector<8x1xf32>
    %208 = vector.broadcast %200 : vector<8x1xf32> to vector<8x256xf32>
    %209 = arith.subf %196, %208 : vector<8x256xf32>
    %cst_139 = arith.constant 9.99999974E-6 : f32
    %210 = vector.broadcast %cst_139 : f32 to vector<8x1xf32>
    %211 = arith.addf %207, %210 : vector<8x1xf32>
    %212 = math.rsqrt %211 : vector<8x1xf32>
    %213 = vector.broadcast %212 : vector<8x1xf32> to vector<8x256xf32>
    %214 = arith.mulf %209, %213 : vector<8x256xf32>
    %215 = vector.broadcast %25 : vector<8x1xf32> to vector<8x256xf32>
    %216 = arith.mulf %214, %215 : vector<8x256xf32>
    %217 = vector.broadcast %26 : vector<8x1xf32> to vector<8x256xf32>
    %218 = arith.addf %216, %217 : vector<8x256xf32>
    %c0_140 = arith.constant 0 : index
    %c0_141 = arith.constant 0 : index
    %219 = vector.load %arg4[%c0_140, %c0_141] : memref<8x4xf32, #tpu.memory_space<vmem>>, vector<8x4xf32>
    %cst_142 = arith.constant dense<0.000000e+00> : vector<8x256xf32>
    %220 = tpu.matmul %219, %30, %cst_142 {dimension_numbers = #tpu.dot_dimension_numbers<[1], [0], [0], [1], [0, 0, 1, 1], [], []>} : vector<8x4xf32>, vector<4x256xf32>, vector<8x256xf32> -> vector<8x256xf32>
    %cst_143 = arith.constant dense<0.000000e+00> : vector<8xf32>
    %221 = vector.multi_reduction <add>, %220, %cst_143 [1] : vector<8x256xf32> to vector<8xf32>
    %222 = vector.shape_cast %221 : vector<8xf32> to vector<8x1xf32>
    %cst_144 = arith.constant 2.560000e+02 : f32
    %223 = vector.broadcast %cst_144 : f32 to vector<8x1xf32>
    %224 = arith.divf %222, %223 : vector<8x1xf32>
    %225 = vector.broadcast %224 : vector<8x1xf32> to vector<8x256xf32>
    %226 = arith.subf %220, %225 : vector<8x256xf32>
    %227 = arith.mulf %226, %226 : vector<8x256xf32>
    %cst_145 = arith.constant dense<0.000000e+00> : vector<8xf32>
    %228 = vector.multi_reduction <add>, %227, %cst_145 [1] : vector<8x256xf32> to vector<8xf32>
    %229 = vector.shape_cast %228 : vector<8xf32> to vector<8x1xf32>
    %cst_146 = arith.constant 2.560000e+02 : f32
    %230 = vector.broadcast %cst_146 : f32 to vector<8x1xf32>
    %231 = arith.divf %229, %230 : vector<8x1xf32>
    %232 = vector.broadcast %224 : vector<8x1xf32> to vector<8x256xf32>
    %233 = arith.subf %220, %232 : vector<8x256xf32>
    %cst_147 = arith.constant 9.99999974E-6 : f32
    %234 = vector.broadcast %cst_147 : f32 to vector<8x1xf32>
    %235 = arith.addf %231, %234 : vector<8x1xf32>
    %236 = math.rsqrt %235 : vector<8x1xf32>
    %237 = vector.broadcast %236 : vector<8x1xf32> to vector<8x256xf32>
    %238 = arith.mulf %233, %237 : vector<8x256xf32>
    %239 = vector.broadcast %27 : vector<8x1xf32> to vector<8x256xf32>
    %240 = arith.mulf %238, %239 : vector<8x256xf32>
    %241 = vector.broadcast %28 : vector<8x1xf32> to vector<8x256xf32>
    %242 = arith.addf %240, %241 : vector<8x256xf32>
    %243 = arith.addf %218, %242 : vector<8x256xf32>
    %cst_148 = arith.constant 0.000000e+00 : f32
    %244 = vector.broadcast %cst_148 : f32 to vector<8x256xf32>
    %245 = arith.maximumf %243, %244 : vector<8x256xf32>
    %c0_149 = arith.constant 0 : index
    %c0_150 = arith.constant 0 : index
    %c0_151 = arith.constant 0 : index
    %246 = vector.load %arg6[%c0_149, %c0_150, %c0_151] : memref<1x8x256xf32, #tpu.memory_space<vmem>>, vector<1x8x256xf32>
    %247 = vector.shape_cast %246 : vector<1x8x256xf32> to vector<8x256xf32>
    %248 = vector.shape_cast %245 : vector<8x256xf32> to vector<1x8x256xf32>
    tpu.vector_store %arg6[%c0_149, %c0_150, %c0_151], %248 {strides = array<i32>} : memref<1x8x256xf32, #tpu.memory_space<vmem>>, vector<1x8x256xf32>,
    return
  }
  func.func @transform_0(%arg0: i32) -> (i32, i32, i32) {
    %c0_i32 = arith.constant 0 : i32
    %c0_i32_0 = arith.constant 0 : i32
    %c0_i32_1 = arith.constant 0 : i32
    return %arg0, %c0_i32, %c0_i32_0 : i32, i32, i32
  }
  func.func @transform_1(%arg0: i32) -> (i32, i32, i32) {
    %c0_i32 = arith.constant 0 : i32
    %c0_i32_0 = arith.constant 0 : i32
    %c0_i32_1 = arith.constant 0 : i32
    %c0_i32_2 = arith.constant 0 : i32
    return %c0_i32, %c0_i32_0, %c0_i32_1 : i32, i32, i32
  }
  func.func @transform_2(%arg0: i32) -> (i32, i32, i32) {
    %c0_i32 = arith.constant 0 : i32
    %c0_i32_0 = arith.constant 0 : i32
    %c0_i32_1 = arith.constant 0 : i32
    %c0_i32_2 = arith.constant 0 : i32
    return %c0_i32, %c0_i32_0, %c0_i32_1 : i32, i32, i32
  }
  func.func @transform_3(%arg0: i32) -> (i32, i32) {
    %c0_i32 = arith.constant 0 : i32
    %c0_i32_0 = arith.constant 0 : i32
    %c0_i32_1 = arith.constant 0 : i32
    return %c0_i32, %c0_i32_0 : i32, i32
  }
  func.func @transform_4(%arg0: i32) -> (i32, i32) {
    %c0_i32 = arith.constant 0 : i32
    %c0_i32_0 = arith.constant 0 : i32
    %c0_i32_1 = arith.constant 0 : i32
    return %c0_i32, %c0_i32_0 : i32, i32
  }
  func.func @transform_5(%arg0: i32) -> (i32, i32, i32) {
    %c0_i32 = arith.constant 0 : i32
    %c0_i32_0 = arith.constant 0 : i32
    %c0_i32_1 = arith.constant 0 : i32
    return %arg0, %c0_i32, %c0_i32_0 : i32, i32, i32
  }
}

</mosaic_0001>

<bundles_post_ra>
// kernel: basic_block_pallas.1
= control target key start
LH: loop header
LB: loop body
LE: loop exit
PB: predicated region body
PF: predicated region fallthrough
CT: control target
= control target key end

     0   :  { %s2364_s18 = smov 0   ;;  %s2723_s0 = inlined_call_operand.vmem [shape: f32[2,4,256], index: 0, kind: input, shape index: {}]   ;;  %s2724_s1 = inlined_call_operand.vmem [shape: f32[9,8,4], index: 1, kind: input, shape index: {}]   ;;  %s2725_s2 = inlined_call_operand.vmem [shape: f32[9,8,8], index: 2, kind: input, shape index: {}]   ;;  %s2726_s3 = inlined_call_operand.vmem [shape: f32[8,4], index: 3, kind: input, shape index: {}]   ;;  %s2727_s4 = inlined_call_operand.vmem [shape: f32[8,6], index: 4, kind: input, shape index: {}]   ;;  %s2728_s5 = inlined_call_operand.vmem [shape: f32[2,8,256], index: 5, kind: output, shape index: {}]  }
   0x1 LB: > { %s2162_s19 = sadd.s32 4294967295, %s2317_s18   ;;  %p2166_p0 = scmp.ge.s32.totalorder %s2317_s18, 1  ;;  %s2317_s18 = sphi %s2364_s18, %s15_s18  }
   0x2   : > { %p187_p1 = scmp.lt.s32.totalorder %s2317_s18, 3 }
   0x4   : > { %p188_p2 = pnand %p2166_p0, %p187_p1 }
   0x5   : > { %p215_p3 = scmp.lt.s32.totalorder (!%p188_p2), %s2162_s19, 1  ;;  %v2319_v0 = vmov (!%p188_p2), 0.0   ;;  %s2320_s24 = smov (!%p188_p2), 16   ;;  %v229_v9 = vlaneseq (!%p188_p2)  ;;  %vm299_vm0 = vcmask (!%p188_p2), 130048   ;;  %vm306_vm1 = vcmask (!%p188_p2), 1043456   ;;  %v2171_v20 = vld [vmem:[%s2724_s1 + $0x8] sm:$0xff] (!%p188_p2) }
   0x6   : > { %191 = sbr.rel (%p188_p2) target bundleno = 1463 (0x5b7), region = 40  ;;  %225 = vst [vmem:[#allocation2] sm:$0xff] (!%p188_p2), %v2319_v0  ;;  %226 = vst [vmem:[#allocation2 + $0x8] sm:$0xff] (!%p188_p2), %v2319_v0  ;;  %375 = vmatprep.mubr.f32.mxu0 (!%p188_p2), %v2319_v0  ;;  %1263 = vmatprep.mubr.f32.mxu1 (!%p188_p2), %v2319_v0  ;;  %s2321_s25 = smov (!%p188_p2), 17   ;;  %vm283_vm2 = vcmask (!%p188_p2), 138240   ;;  %vm302_vm3 = vcmask (!%p188_p2), 31744  }
   0x7   : > { %227 = vst [vmem:[#allocation2 + $0x10] sm:$0xff] (!%p188_p2), %v2319_v0  ;;  %228 = vst [vmem:[#allocation2 + $0x18] sm:$0xff] (!%p188_p2), %v2319_v0  ;;  %s2322_s26 = smov (!%p188_p2), 15   ;;  %s2323_s27 = smov (!%p188_p2), 1   ;;  %v230_v11 = vand.u32 (!%p188_p2), 127, %v229_v9  ;;  %vm472_vm6 = vcmask (!%p188_p2), 121856  }
   0x8   : > { %s2324_s28 = smov (!%p188_p2), 127   ;;  %s2325_s29 = smov (!%p188_p2), 113   ;;  %v290_v34 = vld [vmem:[%s2724_s1] sm:$0xff] (!%p188_p2)  ;;  %vm569_vm9 = vcmask (!%p188_p2), 7168   ;;  %v2178_v44 = vld [vmem:[%s2724_s1 + $0x10] sm:$0xff] (!%p188_p2)  ;;  %vm754_vm10 = vcmask (!%p188_p2), 1039360  }
   0x9   : > { %s2326_s30 = smov (!%p188_p2), 112   ;;  %s2327_s6 = smov (!%p188_p2), 111   ;;  %v231_v12 = vadd.s32 (!%p188_p2), 128, %v230_v11  ;;  %v236_v15 = vand.u32 (!%p188_p2), 15, %v230_v11  ;;  %v2182_v50 = vld [vmem:[%s2724_s1 + $0x18] sm:$0xff] (!%p188_p2)  ;;  %vm851_vm11 = vcmask (!%p188_p2), 924672  }
   0xa   : > { %v2186_v57 = vld [vmem:[%s2724_s1 + $0x20] sm:$0xff] (!%p188_p2)  ;;  %vm950_vm12 = vcmask (!%p188_p2), 916480   ;;  %vm1039_vm13 = vcmask (!%p188_p2), 908288   ;;  %vm1195_vm14 = vcmask (!%p188_p2), 64512   ;;  %v2225_v24 = vld [vmem:[%s2725_s2 + $0x30] sm:$0xff] (!%p188_p2) }
   0xb   : > { %v243_v16 = vand.u32 (!%p188_p2), 15, %v231_v12  ;;  %vm2434_vm4 = vcmp.ge.s32.totalorder (!%p188_p2), %v236_v15, 1  ;;  %vm2463_vm8 = vcmp.lt.s32.totalorder (!%p188_p2), %v236_v15, 15  ;;  %v2198_v15 = vld [vmem:[%s2724_s1 + $0x38] sm:$0xff] (!%p188_p2) }
   0xd   : > { %s2738_s19 = smov (!%p215_p3, %s2162_s19), 1  ;;  %v267_v3 = vld [vmem:[#allocation2] sm:$0xf]  ;;  %vm2440_vm5 = vcmp.ge.s32.totalorder %v243_v16, 1  ;;  %vm2452_vm7 = vcmp.lt.s32.totalorder %v243_v16, 15 }
   0xe   : > { %s2240_s20 = sshll.u32 %s2738_s19, 3  ;;  %293 = vrot.lane.b32.xlu1 %v267_v3, %s2320_s24  ;;  %v744_v6 = vld [vmem:[#allocation2 + $0x18] sm:$0xf]  ;;  %s2241_s9 = sshll.u32 %s2738_s19, 4 }
   0xf   : > { %s219_s23 = scalar_lea.vmem %s2723_s0, %s2240_s20  ;;  %s224_s12 = scalar_lea.vmem %s2728_s5, %s2241_s9 }
  0x10   : > { %v2384_v1 = vld [vmem:[%s219_s23] sm:$0xff] }
  0x11   : > { %265 = vst [vmem:[#allocation2 + $0x8] sm:$0xf] %v2384_v1  ;;  %v2389_v2 = vcombine.high %v2384_v1, %v2384_v1 }
  0x13   : > { %266 = vst [vmem:[#allocation2 + $0x10] sm:$0xf] %v2389_v2 }
  0x18   : > { %v2393_v4 = vld [vmem:[#allocation2 + $0x8] sm:$0xf] }
  0x19   : > { %295 = vrot.lane.b32.xlu0 %v2393_v4, %s2320_s24  ;;  %279 = vrot.lane.b32.xlu1 %v2393_v4, %s2321_s25  ;;  %v742_v8 = vld [vmem:[#allocation2 + $0x8] sm:$0xf] }
  0x1a   : > { %v2399_v5 = vld [vmem:[#allocation2 + $0x10] sm:$0xf] }
  0x1b   : > { %v743_v7 = vld [vmem:[#allocation2 + $0x10] sm:$0xf] }
  0x1d   : > { %297 = vrot.lane.b32.xlu0 %v2399_v5, %s2320_s24  ;;  %277 = vrot.lane.b32.xlu1 %v267_v3, %s2321_s25 }
  0x21   : > { %281 = vrot.lane.b32.xlu0 %v2399_v5, %s2321_s25  ;;  %470 = vrot.lane.b32.xlu1 %v2399_v5, %s2322_s26 }
  0x25   : > { %468 = vrot.lane.b32.xlu0 %v2393_v4, %s2322_s26  ;;  %565 = vrot.lane.b32.xlu1 %v2393_v4, %s2323_s27 }
  0x29   : > { %466 = vrot.lane.b32.xlu0 %v267_v3, %s2322_s26  ;;  %563 = vrot.lane.b32.xlu1 %v267_v3, %s2323_s27  ;;  %v2190_v3 = vld [vmem:[%s2724_s1 + $0x28] sm:$0xff] }
  0x2d   : > { %567 = vrot.lane.b32.xlu0 %v2399_v5, %s2323_s27  ;;  %752 = vrot.lane.b32.xlu1 %v744_v6, %s2324_s28 }
  0x31   : > { %750 = vrot.lane.b32.xlu0 %v743_v7, %s2324_s28  ;;  %847 = vrot.lane.b32.xlu1 %v743_v7, %s2325_s29 }
  0x35   : > { %748 = vrot.lane.b32.xlu0 %v742_v8, %s2324_s28  ;;  %845 = vrot.lane.b32.xlu1 %v742_v8, %s2325_s29 }
  0x39   : > { %849 = vrot.lane.b32.xlu0 %v744_v6, %s2325_s29  ;;  %948 = vrot.lane.b32.xlu1 %v744_v6, %s2326_s30 }
  0x3d   : > { %946 = vrot.lane.b32.xlu0 %v743_v7, %s2326_s30  ;;  %1035 = vrot.lane.b32.xlu1 %v743_v7, %s2327_s6 }
  0x41   : > { %944 = vrot.lane.b32.xlu0 %v742_v8, %s2326_s30  ;;  %1033 = vrot.lane.b32.xlu1 %v742_v8, %s2327_s6 }
  0x45   : > { %1037 = vrot.lane.b32.xlu0 %v744_v6, %s2327_s6 }
  0x80   : > { %v294_v10 = vpop.permute.xlu1 %293 }
  0x8b   : > { %v296_v13 = vpop.permute.xlu0 %295  ;;  %v280_v14 = vpop.permute.xlu1 %279 }
  0x8c   : > { %v300_v21 = vsel %vm299_vm0, %v294_v10, %v296_v13  ;;  %v2194_v10 = vld [vmem:[%s2724_s1 + $0x30] sm:$0xff] }
  0x8f   : > { %v298_v17 = vpop.permute.xlu0 %297  ;;  %v278_v18 = vpop.permute.xlu1 %277 }
  0x90   : > { %v301_v19 = vsel %vm299_vm0, %v296_v13, %v298_v17  ;;  %v284_v23 = vsel %vm283_vm2, %v278_v18, %v280_v14  ;;  %v2202_v17 = vld [vmem:[%s2724_s1 + $0x40] sm:$0xff] }
  0x91   : > { %2172 = vmatprep.subr.msk.mxu0 %vm306_vm1, %v301_v19  ;;  %v288_v27 = vsel %vm2434_vm4, %v284_v23, 0.0  ;;  %v2329_v23 = vmov 1  }
  0x92   : > { %2173 = vmatpush1.msk.msra.mxu0 %vm306_vm1, %v300_v21  ;;  %v2556_v21 = vld [vmem:[%s2727_s4] sm:$0xff]  ;;  %2298 = vset.pattern.permute.xlu1 %v2329_v23 }
  0x93   : > { %2174 = vmatmul.mubr.msk.f32.vlgmr.msra.gmra.mrb[0].mxu0 %vm302_vm3, %v2171_v20  ;;  %v282_v25 = vpop.permute.xlu0 %281  ;;  %v471_v26 = vpop.permute.xlu1 %470 }
  0x94   : > { %v285_v28 = vsel %vm283_vm2, %v280_v14, %v282_v25  ;;  %455 = vmatprep.mubr.f32.mxu0 %v2319_v0 }
  0x95   : > { %v289_v29 = vsel %vm2440_vm5, %v285_v28, 0.0 }
  0x96   : > { %2175 = vmatprep.subr.msk.mxu0 %vm306_vm1, %v289_v29 }
  0x97   : > { %2176 = vmatpush1.msk.msra.mxu0 %vm306_vm1, %v288_v27  ;;  %v469_v31 = vpop.permute.xlu0 %468  ;;  %v566_v32 = vpop.permute.xlu1 %565 }
  0x98   : > { %v474_v33 = vsel %vm472_vm6, %v469_v31, %v471_v26 }
  0x99   : > { %v478_v35 = vsel %vm2452_vm7, %v474_v33, 0.0 }
  0x9a   : > { %2179 = vmatprep.subr.msk.mxu0 %vm306_vm1, %v478_v35 }
  0x9b   : > { %2177 = vmatmul.mubr.msk.f32.vlgmr.msra.gmra.mrb[0].mxu0 %vm302_vm3, %v290_v34  ;;  %v467_v37 = vpop.permute.xlu0 %466  ;;  %v564_v38 = vpop.permute.xlu1 %563 }
  0x9c   : > { %v473_v39 = vsel %vm472_vm6, %v467_v37, %v469_v31  ;;  %554 = vmatprep.mubr.f32.mxu0 %v2319_v0  ;;  %v570_v41 = vsel %vm569_vm9, %v564_v38, %v566_v32 }
  0x9d   : > { %v477_v40 = vsel %vm2463_vm8, %v473_v39, 0.0  ;;  %v574_v46 = vsel %vm2434_vm4, %v570_v41, 0.0 }
  0x9e   : > { %2180 = vmatpush1.msk.msra.mxu0 %vm306_vm1, %v477_v40 }
  0x9f   : > { %v568_v42 = vpop.permute.xlu0 %567  ;;  %v753_v48 = vpop.permute.xlu1 %752 }
  0xa0   : > { %v571_v43 = vsel %vm569_vm9, %v566_v32, %v568_v42  ;;  %v1994_v32 = vld [vmem:[%s2726_s3] sm:$0xff] }
  0xa1   : > { %v575_v45 = vsel %vm2440_vm5, %v571_v43, 0.0 }
  0xa2   : > { %2183 = vmatprep.subr.msk.mxu0 %vm306_vm1, %v575_v45 }
  0xa3   : > { %2181 = vmatmul.mubr.msk.f32.vlgmr.msra.gmra.mrb[0].mxu0 %vm302_vm3, %v2178_v44  ;;  %v751_v47 = vpop.permute.xlu0 %750  ;;  %v848_v54 = vpop.permute.xlu1 %847 }
  0xa4   : > { %2184 = vmatpush1.msk.msra.mxu0 %vm306_vm1, %v574_v46  ;;  %651 = vmatprep.mubr.f32.mxu0 %v2319_v0  ;;  %v756_v49 = vsel %vm754_vm10, %v751_v47, %v753_v48 }
  0xa5   : > { %2187 = vmatprep.subr.msk.mxu0 %vm306_vm1, %v2399_v5  ;;  %v760_v52 = vsel %vm2452_vm7, %v756_v49, 0.0 }
  0xa7   : > { %v749_v51 = vpop.permute.xlu0 %748  ;;  %v846_v61 = vpop.permute.xlu1 %845 }
  0xa8   : > { %v755_v55 = vsel %vm754_vm10, %v749_v51, %v751_v47  ;;  %v852_v62 = vsel %vm851_vm11, %v846_v61, %v848_v54 }
  0xa9   : > { %v759_v58 = vsel %vm2463_vm8, %v755_v55, 0.0  ;;  %v856_v5 = vsel %vm2434_vm4, %v852_v62, 0.0  ;;  %v1182_v62 = vld [vmem:[%s2725_s2] sm:$0xff] }
  0xab   : > { %2185 = vmatmul.mubr.msk.f32.vlgmr.msra.gmra.mrb[0].mxu0 %vm302_vm3, %v2182_v50  ;;  %v850_v53 = vpop.permute.xlu0 %849  ;;  %v949_v63 = vpop.permute.xlu1 %948 }
  0xac   : > { %2188 = vmatpush1.msk.msra.mxu0 %vm306_vm1, %v2393_v4  ;;  %733 = vmatprep.mubr.f32.mxu0 %v2319_v0  ;;  %v853_v56 = vsel %vm851_vm11, %v848_v54, %v850_v53 }
  0xad   : > { %2191 = vmatprep.subr.msk.mxu0 %vm306_vm1, %v760_v52  ;;  %v857_v59 = vsel %vm2440_vm5, %v853_v56, 0.0  ;;  %v2206_v52 = vld [vmem:[%s2725_s2 + $0x8] sm:$0xff] }
  0xaf   : > { %v947_v60 = vpop.permute.xlu0 %946  ;;  %v1036_v8 = vpop.permute.xlu1 %1035 }
  0xb0   : > { %v952_v6 = vsel %vm950_vm12, %v947_v60, %v949_v63 }
  0xb3   : > { %2189 = vmatmul.mubr.msk.f32.vlgmr.msra.gmra.mrb[0].mxu0 %vm302_vm3, %v2186_v57  ;;  %v945_v4 = vpop.permute.xlu0 %944  ;;  %v1034_v13 = vpop.permute.xlu1 %1033 }
  0xb4   : > { %2192 = vmatpush1.msk.msra.mxu0 %vm306_vm1, %v759_v58  ;;  %836 = vmatprep.mubr.f32.mxu0 %v2319_v0  ;;  %v951_v11 = vsel %vm950_vm12, %v945_v4, %v947_v60  ;;  %v1040_v14 = vsel %vm1039_vm13, %v1034_v13, %v1036_v8 }
  0xb5   : > { %2195 = vmatprep.subr.msk.mxu0 %vm306_vm1, %v857_v59  ;;  %v1044_v16 = vsel %vm2463_vm8, %v1040_v14, 0.0 }
  0xb7   : > { %v1038_v7 = vpop.permute.xlu0 %1037 }
  0xb8   : > { %v1041_v9 = vsel %vm1039_vm13, %v1036_v8, %v1038_v7 }
  0xb9   : > { %v1045_v12 = vsel %vm2452_vm7, %v1041_v9, 0.0  ;;  %v2211_v9 = vld [vmem:[%s2725_s2 + $0x10] sm:$0xff] }
  0xbb   : > { %2193 = vmatmul.mubr.msk.f32.vlgmr.msra.gmra.mrb[0].mxu0 %vm302_vm3, %v2190_v3 }
  0xbc   : > { %2196 = vmatpush1.msk.msra.mxu0 %vm306_vm1, %v856_v5  ;;  %933 = vmatprep.mubr.f32.mxu0 %v2319_v0 }
  0xbd   : > { %2199 = vmatprep.subr.msk.mxu0 %vm306_vm1, %v952_v6 }
  0xc3   : > { %2197 = vmatmul.mubr.msk.f32.vlgmr.msra.gmra.mrb[0].mxu0 %vm302_vm3, %v2194_v10 }
  0xc4   : > { %2200 = vmatpush1.msk.msra.mxu0 %vm306_vm1, %v951_v11  ;;  %1024 = vmatprep.mubr.f32.mxu0 %v2319_v0 }
  0xc5   : > { %2203 = vmatprep.subr.msk.mxu0 %vm306_vm1, %v1045_v12 }
  0xcb   : > { %2201 = vmatmul.mubr.msk.f32.vlgmr.msra.gmra.mrb[0].mxu0 %vm302_vm3, %v2198_v15  ;;  %v2215_v15 = vld [vmem:[%s2725_s2 + $0x18] sm:$0xff] }
  0xcc   : > { %2204 = vmatpush1.msk.msra.mxu0 %vm306_vm1, %v1044_v16  ;;  %1121 = vmatprep.mubr.f32.mxu0 %v2319_v0 }
  0xcd   : > { %2235 = vmatprep.subr.msk.mxu0 %vm306_vm1, %v2389_v2  ;;  %v2328_v2 = vmov 0  }
  0xce   : > { %2297 = vset.pattern.permute.xlu0 %v2328_v2 }
  0xd3   : > { %2205 = vmatmul.mubr.msk.f32.vlgmr.msra.gmra.mrb[0].mxu0 %vm302_vm3, %v2202_v17 }
  0xd4   : > { %2236 = vmatpush1.msk.msra.mxu0 %vm306_vm1, %v2384_v1  ;;  %2066 = vmatprep.mubr.f32.mxu0 %v2319_v0 }
  0xd7   : > { %2237 = vmatmul.mubr.msk.f32.vlgmr.msra.gmra.mrb[2].mxu0 %vm302_vm3, %v1994_v32 }
 0x1a6   : > { %v1123_v18 = vpop.f32.mrb[0].mxu0 }
 0x1a7   : > { %v1125_v19 = vpop.f32.mrb[1].mxu0 }
 0x1a8   : > { %v1130_v20 = vadd.f32 %v1125_v19, %v1123_v18 }
 0x1aa   : > { %1131 = vadd.xlane.f32.xlu0 %v1130_v20  ;;  %v2623_v54 = vpop.f32.mrb[2].mxu0 }
 0x1ab   : > { %v2627_v56 = vpop.f32.mrb[3].mxu0 }
 0x1ac   : > { %v2073_v57 = vadd.f32 %v2627_v56, %v2623_v54 }
 0x1c0   : > { %1149 = vperm.xlu0 %2297, %v2556_v21  }
 0x237   : > { %v1132_v25 = vpop.xlane.xlu0 %1131 }
 0x238   : > { %v1134_v26 = vmul.f32 0.00390625, %v1132_v25 }
 0x23a   : > { %v1135_v1 = vsub.f32 %v1123_v18, %v1134_v26  ;;  %v1136_v27 = vsub.f32 %v1125_v19, %v1134_v26  ;;  %v2219_v19 = vld [vmem:[%s2725_s2 + $0x20] sm:$0xff] }
 0x23c   : > { %v1137_v28 = vmul.f32 %v1135_v1, %v1135_v1  ;;  %v1138_v29 = vmul.f32 %v1136_v27, %v1136_v27 }
 0x23e   : > { %v1139_v31 = vadd.f32 %v1138_v29, %v1137_v28 }
 0x23f   : > { %v1150_v38 = vpop.permute.xlu0 %1149 }
 0x240   : > { %1140 = vadd.xlane.f32.xlu1 %v1139_v31 }
 0x251   : > { %1155 = vperm.xlu1 %2298, %v2556_v21  }
 0x255   : > { %1185 = vrot.lane.b32.xlu1 %v2319_v0, %s2320_s24 }
 0x2cd   : > { %v1141_v33 = vpop.xlane.xlu1 %1140 }
 0x2ce   : > { %v1142_v34 = vmul.f32 0.00390625, %v1141_v33 }
 0x2d0   : > { %v1143_v35 = vadd.f32 1e-05, %v1142_v34 }
 0x2d1   : > { %v1156_v41 = vpop.permute.xlu1 %1155 }
 0x2d2   : > { %2305 = vrsqrt.f32 %v1143_v35 }
 0x2d5   : > { %v1186_v48 = vpop.permute.xlu1 %1185 }
 0x2dc   : > { %v2306_v37 = vpop.eup %2305 }
 0x2dd   : > { %v1145_v39 = vmul.f32 %v2306_v37, %v1135_v1  ;;  %v1146_v40 = vmul.f32 %v2306_v37, %v1136_v27  ;;  %v2221_v1 = vld [vmem:[%s2725_s2 + $0x28] sm:$0xff]  ;;  %v2229_v37 = vld [vmem:[%s2725_s2 + $0x38] sm:$0xff] }
 0x2df   : > { %v1152_v42 = vmul.f32 %v1150_v38, %v1145_v39  ;;  %v1153_v43 = vmul.f32 %v1150_v38, %v1146_v40  ;;  %v2231_v39 = vld [vmem:[%s2725_s2 + $0x40] sm:$0xff] }
 0x2e1   : > { %v1158_v44 = vadd.f32 %v1156_v41, %v1152_v42  ;;  %v1159_v45 = vadd.f32 %v1156_v41, %v1153_v43 }
 0x2e3   : > { %v2566_v46 = vmax.f32 %v1158_v44, 0.0  ;;  %v2568_v47 = vmax.f32 %v1159_v45, 0.0 }
 0x2e5   : > { %1162 = vst [vmem:[#allocation2 + $0x8] sm:$0xff] %v2566_v46  ;;  %1163 = vst [vmem:[#allocation2 + $0x10] sm:$0xff] %v2568_v47  ;;  %1346 = vrot.lane.b32.xlu0 %v2566_v46, %s2322_s26  ;;  %1187 = vrot.lane.b32.xlu1 %v2566_v46, %s2320_s24 }
 0x2e9   : > { %1344 = vrot.lane.b32.xlu0 %v2319_v0, %s2322_s26  ;;  %1189 = vrot.lane.b32.xlu1 %v2568_v47, %s2320_s24 }
 0x2ed   : > { %1438 = vrot.lane.b32.xlu0 %v2568_v47, %s2323_s27  ;;  %1172 = vrot.lane.b32.xlu1 %v2566_v46, %s2321_s25 }
 0x2f1   : > { %1610 = vrot.lane.b32.xlu0 %v2568_v47, %s2324_s28  ;;  %1174 = vrot.lane.b32.xlu1 %v2568_v47, %s2321_s25 }
 0x2f5   : > { %1608 = vrot.lane.b32.xlu0 %v2566_v46, %s2324_s28  ;;  %1170 = vrot.lane.b32.xlu1 %v2319_v0, %s2321_s25 }
 0x2f9   : > { %1702 = vrot.lane.b32.xlu0 %v2319_v0, %s2325_s29  ;;  %1348 = vrot.lane.b32.xlu1 %v2568_v47, %s2322_s26 }
 0x2fd   : > { %1792 = vrot.lane.b32.xlu0 %v2568_v47, %s2326_s30  ;;  %1436 = vrot.lane.b32.xlu1 %v2566_v46, %s2323_s27 }
 0x301   : > { %1790 = vrot.lane.b32.xlu0 %v2566_v46, %s2326_s30  ;;  %1434 = vrot.lane.b32.xlu1 %v2319_v0, %s2323_s27 }
 0x305   : > { %1612 = vrot.lane.b32.xlu1 %v2319_v0, %s2324_s28  ;;  %1880 = vrot.lane.b32.xlu0 %v2319_v0, %s2327_s6 }
 0x309   : > { %1700 = vrot.lane.b32.xlu1 %v2568_v47, %s2325_s29 }
 0x30d   : > { %1698 = vrot.lane.b32.xlu1 %v2566_v46, %s2325_s29 }
 0x311   : > { %1794 = vrot.lane.b32.xlu1 %v2319_v0, %s2326_s30 }
 0x315   : > { %1878 = vrot.lane.b32.xlu1 %v2568_v47, %s2327_s6 }
 0x319   : > { %1876 = vrot.lane.b32.xlu1 %v2566_v46, %s2327_s6 }
 0x33d   : > { %2074 = vadd.xlane.f32.xlu1 %v2073_v57 }
 0x357   : > { %v1188_v49 = vpop.permute.xlu1 %1187  ;;  %v1347_v58 = vpop.permute.xlu0 %1346 }
 0x358   : > { %v1191_v53 = vsel %vm299_vm0, %v1186_v48, %v1188_v49  ;;  %v2331_v48 = vmov 4  }
 0x359   : > { %2300 = vset.pattern.permute.xlu0 %v2331_v48 }
 0x35b   : > { %v1190_v50 = vpop.permute.xlu1 %1189  ;;  %v1345_v63 = vpop.permute.xlu0 %1344 }
 0x35c   : > { %v1192_v51 = vsel %vm299_vm0, %v1188_v49, %v1190_v50  ;;  %v1350_v6 = vsel %vm472_vm6, %v1345_v63, %v1347_v58  ;;  %v2332_v49 = vmov 3   ;;  %v2333_v50 = vmov 5  }
 0x35d   : > { %1199 = vmatprep.subr.mxu1 %v1192_v51 }
 0x35e   : > { %1200 = vmatpush1.msra.mxu1 %v1191_v53 }
 0x35f   : > { %v1173_v55 = vpop.permute.xlu1 %1172  ;;  %2207 = vmatmul.mubr.msk.f32.vlgmr.msra.gmra.mrb[0].mxu1 %vm1195_vm14, %v2206_v52  ;;  %v1439_v7 = vpop.permute.xlu0 %1438 }
 0x360   : > { %1337 = vmatprep.mubr.f32.mxu1 %v2319_v0 }
 0x363   : > { %v1175_v59 = vpop.permute.xlu1 %1174  ;;  %v1611_v12 = vpop.permute.xlu0 %1610 }
 0x364   : > { %v1177_v60 = vsel %vm283_vm2, %v1173_v55, %v1175_v59 }
 0x365   : > { %2208 = vmatprep.subr.msk.mxu1 %vm2440_vm5, %v1177_v60 }
 0x367   : > { %v1171_v61 = vpop.permute.xlu1 %1170  ;;  %v1609_v16 = vpop.permute.xlu0 %1608 }
 0x368   : > { %v1176_v3 = vsel %vm283_vm2, %v1171_v61, %v1173_v55  ;;  %v1614_v2 = vsel %vm754_vm10, %v1609_v16, %v1611_v12 }
 0x369   : > { %2209 = vmatpush1.msk.msra.mxu1 %vm2434_vm4, %v1176_v3 }
 0x36a   : > { %2210 = vmatmul.mubr.msk.f32.vlgmr.msra.gmra.mrb[0].mxu1 %vm1195_vm14, %v1182_v62 }
 0x36b   : > { %v1349_v4 = vpop.permute.xlu1 %1348  ;;  %1425 = vmatprep.mubr.f32.mxu1 %v2319_v0  ;;  %v1703_v20 = vpop.permute.xlu0 %1702 }
 0x36c   : > { %v1351_v5 = vsel %vm472_vm6, %v1347_v58, %v1349_v4 }
 0x36d   : > { %2212 = vmatprep.subr.msk.mxu1 %vm2452_vm7, %v1351_v5 }
 0x36e   : > { %2213 = vmatpush1.msk.msra.mxu1 %vm2463_vm8, %v1350_v6 }
 0x36f   : > { %v1437_v8 = vpop.permute.xlu1 %1436  ;;  %v1793_v26 = vpop.permute.xlu0 %1792 }
 0x370   : > { %v1441_v10 = vsel %vm569_vm9, %v1437_v8, %v1439_v7 }
 0x371   : > { %2216 = vmatprep.subr.msk.mxu1 %vm2440_vm5, %v1441_v10 }
 0x372   : > { %2214 = vmatmul.mubr.msk.f32.vlgmr.msra.gmra.mrb[0].mxu1 %vm1195_vm14, %v2211_v9 }
 0x373   : > { %v1435_v11 = vpop.permute.xlu1 %1434  ;;  %1515 = vmatprep.mubr.f32.mxu1 %v2319_v0  ;;  %v1791_v31 = vpop.permute.xlu0 %1790 }
 0x374   : > { %v1440_v13 = vsel %vm569_vm9, %v1435_v11, %v1437_v8  ;;  %v1796_v34 = vsel %vm950_vm12, %v1791_v31, %v1793_v26 }
 0x375   : > { %2217 = vmatpush1.msk.msra.mxu1 %vm2434_vm4, %v1440_v13 }
 0x376   : > { %1529 = vmatprep.subr.mxu1 %v2568_v47 }
 0x377   : > { %v1613_v14 = vpop.permute.xlu1 %1612  ;;  %v1881_v32 = vpop.permute.xlu0 %1880 }
 0x378   : > { %v1615_v17 = vsel %vm754_vm10, %v1611_v12, %v1613_v14 }
 0x37a   : > { %2218 = vmatmul.mubr.msk.f32.vlgmr.msra.gmra.mrb[0].mxu1 %vm1195_vm14, %v2215_v15 }
 0x37b   : > { %1530 = vmatpush1.msra.mxu1 %v2566_v46  ;;  %1593 = vmatprep.mubr.f32.mxu1 %v2319_v0  ;;  %v1701_v18 = vpop.permute.xlu1 %1700 }
 0x37c   : > { %2222 = vmatprep.subr.msk.mxu1 %vm2452_vm7, %v1615_v17  ;;  %v1705_v25 = vsel %vm851_vm11, %v1701_v18, %v1703_v20 }
 0x37f   : > { %v1699_v23 = vpop.permute.xlu1 %1698 }
 0x380   : > { %v1704_v28 = vsel %vm851_vm11, %v1699_v23, %v1701_v18 }
 0x382   : > { %2220 = vmatmul.mubr.msk.f32.vlgmr.msra.gmra.mrb[0].mxu1 %vm1195_vm14, %v2219_v19 }
 0x383   : > { %2223 = vmatpush1.msk.msra.mxu1 %vm2463_vm8, %v1614_v2  ;;  %1689 = vmatprep.mubr.f32.mxu1 %v2319_v0  ;;  %v1795_v27 = vpop.permute.xlu1 %1794 }
 0x384   : > { %2226 = vmatprep.subr.msk.mxu1 %vm2440_vm5, %v1705_v25  ;;  %v1797_v29 = vsel %vm950_vm12, %v1793_v26, %v1795_v27 }
 0x387   : > { %v1879_v33 = vpop.permute.xlu1 %1878 }
 0x388   : > { %v1883_v35 = vsel %vm1039_vm13, %v1879_v33, %v1881_v32 }
 0x38a   : > { %2224 = vmatmul.mubr.msk.f32.vlgmr.msra.gmra.mrb[0].mxu1 %vm1195_vm14, %v2221_v1 }
 0x38b   : > { %2227 = vmatpush1.msk.msra.mxu1 %vm2434_vm4, %v1704_v28  ;;  %1779 = vmatprep.mubr.f32.mxu1 %v2319_v0  ;;  %v1877_v22 = vpop.permute.xlu1 %1876 }
 0x38c   : > { %1803 = vmatprep.subr.mxu1 %v1797_v29  ;;  %v1882_v38 = vsel %vm1039_vm13, %v1877_v22, %v1879_v33 }
 0x392   : > { %2228 = vmatmul.mubr.msk.f32.vlgmr.msra.gmra.mrb[0].mxu1 %vm1195_vm14, %v2225_v24 }
 0x393   : > { %1804 = vmatpush1.msra.mxu1 %v1796_v34  ;;  %1867 = vmatprep.mubr.f32.mxu1 %v2319_v0 }
 0x394   : > { %2232 = vmatprep.subr.msk.mxu1 %vm2452_vm7, %v1883_v35 }
 0x39a   : > { %2230 = vmatmul.mubr.msk.f32.vlgmr.msra.gmra.mrb[0].mxu1 %vm1195_vm14, %v2229_v37 }
 0x39b   : > { %2233 = vmatpush1.msk.msra.mxu1 %vm2463_vm8, %v1882_v38  ;;  %1957 = vmatprep.mubr.f32.mxu1 %v2319_v0  ;;  %v2330_v0 = vmov 2  }
 0x39c   : > { %2299 = vset.pattern.permute.xlu1 %v2330_v0 }
 0x39d   : > { %1983 = vperm.xlu1 %2299, %v2556_v21  }
 0x3a1   : > { %2301 = vset.pattern.permute.xlu1 %v2332_v49 }
 0x3a2   : > { %2234 = vmatmul.mubr.msk.f32.vlgmr.msra.gmra.mrb[0].mxu1 %vm1195_vm14, %v2231_v39  ;;  %1989 = vperm.xlu1 %2301, %v2556_v21  }
 0x3a6   : > { %2302 = vset.pattern.permute.xlu1 %v2333_v50 }
 0x3a7   : > { %2096 = vperm.xlu1 %2302, %v2556_v21  }
 0x3ca   : > { %v2075_v30 = vpop.xlane.xlu1 %2074 }
 0x3cb   : > { %v2076_v40 = vmul.f32 0.00390625, %v2075_v30 }
 0x3cd   : > { %v2077_v41 = vsub.f32 %v2623_v54, %v2076_v40  ;;  %v2078_v42 = vsub.f32 %v2627_v56, %v2076_v40 }
 0x3cf   : > { %v2079_v46 = vmul.f32 %v2077_v41, %v2077_v41  ;;  %v2080_v36 = vmul.f32 %v2078_v42, %v2078_v42 }
 0x3d1   : > { %v2081_v47 = vadd.f32 %v2080_v36, %v2079_v46 }
 0x41c   : > { %v1984_v3 = vpop.permute.xlu1 %1983 }
 0x421   : > { %v1990_v5 = vpop.permute.xlu1 %1989 }
 0x426   : > { %v2097_v13 = vpop.permute.xlu1 %2096 }
 0x475   : > { %v1959_v43 = vpop.f32.mrb[0].mxu1 }
 0x476   : > { %v1961_v44 = vpop.f32.mrb[1].mxu1 }
 0x477   : > { %v1966_v45 = vadd.f32 %v1961_v44, %v1959_v43 }
 0x479   : > { %1967 = vadd.xlane.f32.xlu0 %v1966_v45 }
 0x47d   : > { %2082 = vadd.xlane.f32.xlu0 %v2081_v47 }
 0x506   : > { %v1968_v51 = vpop.xlane.xlu0 %1967 }
 0x507   : > { %v1969_v52 = vmul.f32 0.00390625, %v1968_v51 }
 0x509   : > { %v1970_v53 = vsub.f32 %v1959_v43, %v1969_v52  ;;  %v1971_v54 = vsub.f32 %v1961_v44, %v1969_v52 }
 0x50a   : > { %v2083_v58 = vpop.xlane.xlu0 %2082 }
 0x50b   : > { %v1972_v55 = vmul.f32 %v1970_v53, %v1970_v53  ;;  %v1973_v56 = vmul.f32 %v1971_v54, %v1971_v54  ;;  %v2084_v59 = vmul.f32 0.00390625, %v2083_v58 }
 0x50d   : > { %v1974_v57 = vadd.f32 %v1973_v56, %v1972_v55  ;;  %v2085_v60 = vadd.f32 1e-05, %v2084_v59 }
 0x50f   : > { %1975 = vadd.xlane.f32.xlu0 %v1974_v57  ;;  %2307 = vrsqrt.f32 %v2085_v60 }
 0x519   : > { %v2308_v4 = vpop.eup %2307 }
 0x51a   : > { %v2087_v7 = vmul.f32 %v2308_v4, %v2077_v41  ;;  %v2088_v8 = vmul.f32 %v2308_v4, %v2078_v42 }
 0x525   : > { %2090 = vperm.xlu0 %2300, %v2556_v21  }
 0x529   : > { %2303 = vset.pattern.permute.xlu0 %v2333_v50 }
 0x59c   : > { %v1976_v61 = vpop.xlane.xlu0 %1975 }
 0x59d   : > { %v1977_v62 = vmul.f32 0.00390625, %v1976_v61 }
 0x59f   : > { %v1978_v63 = vadd.f32 1e-05, %v1977_v62 }
 0x5a1   : > { %2309 = vrsqrt.f32 %v1978_v63 }
 0x5a4   : > { %v2091_v6 = vpop.permute.xlu0 %2090 }
 0x5a5   : > { %v2093_v21 = vmul.f32 %v2091_v6, %v2087_v7  ;;  %v2094_v12 = vmul.f32 %v2091_v6, %v2088_v8 }
 0x5a7   : > { %v2099_v18 = vadd.f32 %v2097_v13, %v2093_v21  ;;  %v2100_v19 = vadd.f32 %v2097_v13, %v2094_v12 }
 0x5ab   : > { %v2310_v9 = vpop.eup %2309 }
 0x5ac   : > { %v1980_v10 = vmul.f32 %v2310_v9, %v1970_v53  ;;  %v1981_v11 = vmul.f32 %v2310_v9, %v1971_v54 }
 0x5ae   : > { %v1986_v14 = vmul.f32 %v1984_v3, %v1980_v10  ;;  %v1987_v15 = vmul.f32 %v1984_v3, %v1981_v11 }
 0x5b0   : > { %v1992_v16 = vadd.f32 %v1990_v5, %v1986_v14  ;;  %v1993_v17 = vadd.f32 %v1990_v5, %v1987_v15 }
 0x5b2   : > { %v2101_v20 = vadd.f32 %v2099_v18, %v1992_v16  ;;  %v2102_v2 = vadd.f32 %v2100_v19, %v1993_v17 }
 0x5b4   : > { %v2103_v23 = vmax.f32 %v2101_v20, 0.0  ;;  %v2104_v25 = vmax.f32 %v2102_v2, 0.0 }
 0x5b6   : > { %2105 = vst [vmem:[%s224_s12] sm:$0xff] %v2103_v23  ;;  %2106 = vst [vmem:[%s224_s12 + $0x8] sm:$0xff] %v2104_v25 }
 0x5b7 PF: > { %s15_s18 = sadd.s32 1, %s2317_s18  }
 0x5b8   : > { %p12_p4 = scmp.ge.s32.totalorder %s15_s18, 4  }
 0x5ba   :  { %14 = sbr.rel (!%p12_p4) target bundleno = 1 (0x1), region = 86 }

</bundles_post_ra>
